<compile_context>
chip_gen: v7x
topology: tpu7x:2x2x1
jax: 0.10.0
libtpu: 0.0.40
codegen_flags: <defaults>
</compile_context>

<pallas_src>
import jax
import jax.numpy as jnp
from jax import lax
from jax.experimental import pallas as pl
from jax.experimental.pallas import tpu as pltpu

# ----------------------------- config ---------------------------------------
LAST_LAYER_INPUT_SIZE = 128   # H : hidden size of the (stub) base model
HIDDEN = 64                   # Linear(H, 64)
NO_OF_CLASSES = 8             # C
OUT_PAD = 128                 # lane-dense padded output width (>= C, mult of 128)
DROP_OUT_RATE = 0.1           # dropout is identity in eval mode (see TODO)
LN_EPS = 1e-5
BATCH = 8
SEQ = 16
VOCAB = 32


def _pick_tile_b(batch):
    """Batch tile selection.

    Tiny batches (<32): one full-array block (per-step overhead dominates, so
    don't split -- this is also the v7x 'skip the split for tiny B' case).
    Larger batches: largest multiple-of-16 divisor of `batch` (bf16 sublane
    packing is (16,128)), capped at 2048 rows, preferring 2-8 grid steps so
    both v7x TensorCores get work and the pipeline has something to overlap.
    """
    if batch < 32:
        return batch
    start = (min(batch, 2048) // 16) * 16
    best = None
    for t in range(start, 15, -16):
        if batch % t == 0:
            steps = batch // t
            if 2 <= steps <= 8:
                return t
            if best is None:
                best = t
    return best if best is not None else batch


def _vmem_limit_bytes(tb):
    """Explicit VMEM budget from the real tile footprint (keeps v7x's 64 MiB
    physical / 32 MiB default scoped limit honest if H ever grows)."""
    bf16, f32 = 2, 4
    H, Hd = LAST_LAYER_INPUT_SIZE, HIDDEN
    io = 2 * tb * H * bf16 + 2 * tb * OUT_PAD * bf16                    # double-buffered x / out
    weights = (H * H + H * Hd + Hd * OUT_PAD) * bf16 + 8 * OUT_PAD * f32  # single-buffered consts
    interm = 2 * tb * (H + Hd + Hd + OUT_PAD) * f32                     # f32 p/h/z/out (2x slack)
    return int(max(2 * (io + weights + interm), 4 << 20))


# ----------------------------- Pallas kernel --------------------------------
def fused_kernel(x_ref, wpool_ref, w3_ref, w6_ref, consts_ref, o_ref):
    """tanh(x @ w_pool + b_pool) -> Linear(H,64) -> LayerNorm(64) -> Linear(64,C)
    with gamma/beta/b6 pre-folded into w6/b_out; bf16 MXU operands with f32
    accumulation; f32 VPU/EUP math (v5e has no bf16 VPU); one wide lane-dense
    bf16 store per step."""
    H = LAST_LAYER_INPUT_SIZE
    x = x_ref[...]                                    # [tb, H] bf16 (already cast by producer)
    consts = consts_ref[...]                          # [3, OUT_PAD] f32
    b_pool = consts[0:1, :H]                          # [1, H]
    b3 = consts[1:2, :HIDDEN]                         # [1, 64]
    b_out = consts[2:3, :]                            # [1, OUT_PAD] = beta @ w6 + b6 (padded)

    # TODO(synk): Dropout(DROP_OUT_RATE) (l2, l5) omitted (eval-mode identity);
    # a training-mode version would use pltpu.prng_seed + stateful_bernoulli.

    # base-model pooler head: tanh(dense(H, H)) fused in (bf16 operands, f32 acc)
    p = jnp.dot(x, wpool_ref[...], preferred_element_type=jnp.float32) + b_pool
    p = jnp.tanh(p)                                   # [tb, H] f32 (EUP)

    # l3: Linear(H, 64)
    h = jnp.dot(p.astype(jnp.bfloat16), w3_ref[...],
                preferred_element_type=jnp.float32) + b3            # [tb, 64]

    # l4: LayerNorm(64), biased variance (matches torch.nn.LayerNorm); f32 VPU math.
    mean = jnp.mean(h, axis=-1, keepdims=True)
    diff = h - mean
    var = jnp.mean(diff * diff, axis=-1, keepdims=True)
    z = diff * lax.rsqrt(var + LN_EPS)                              # [tb, 64]

    # l6: Linear(64, C) padded to N=128 (gamma folded into w6, beta/b6 into b_out)
    out = jnp.dot(z.astype(jnp.bfloat16), w6_ref[...],
                  preferred_element_type=jnp.float32) + b_out       # [tb, OUT_PAD] f32
    # Single full-tile cast + one unmasked lane-dense bf16 store (halves vst bytes).
    o_ref[...] = out.astype(jnp.bfloat16)


def fused_head_forward(pre_bf16, w_pool, w3, w6, consts):
    """pre_bf16: [B, H] bf16 pooled features -> padded logits [B, OUT_PAD] bf16."""
    B, H = pre_bf16.shape
    tb = _pick_tile_b(B)
    assert B % tb == 0
    grid = (B // tb,)
    # Constant-index operands: single-buffer them (index_map is (0,0) for every
    # grid step, so a second buffer is pure VMEM / prologue-DMA waste).
    return pl.pallas_call(
        fused_kernel,
        out_shape=jax.ShapeDtypeStruct((B, OUT_PAD), jnp.bfloat16),
        grid_spec=pl.GridSpec(
            grid=grid,
            in_specs=[
                pl.BlockSpec((tb, H), lambda i: (i, 0)),             # x (batch-tiled, bf16)
                pl.BlockSpec((H, H), lambda i: (0, 0),
                             pipeline_mode=pl.Buffered(1)),          # w_pool (resident)
                pl.BlockSpec((H, HIDDEN), lambda i: (0, 0),
                             pipeline_mode=pl.Buffered(1)),          # w3
                pl.BlockSpec((HIDDEN, OUT_PAD), lambda i: (0, 0),
                             pipeline_mode=pl.Buffered(1)),          # w6 (gamma folded, padded)
                pl.BlockSpec((3, OUT_PAD), lambda i: (0, 0),
                             pipeline_mode=pl.Buffered(1)),          # packed biases
            ],
            out_specs=pl.BlockSpec((tb, OUT_PAD), lambda i: (i, 0)),
        ),
        # Single batch axis; 'parallel' lets a multi-step grid shard across the
        # two v7x TensorCores.  Explicit VMEM budget sized from the tile
        # footprint (v7x: 64 MiB physical, 32 MiB default scoped).
        compiler_params=pltpu.CompilerParams(
            dimension_semantics=("parallel",),
            vmem_limit_bytes=_vmem_limit_bytes(tb)),
    )(pre_bf16, w_pool, w3, w6, consts)


# ----------------------- parameter packing / folding ------------------------
def pack_head_params(params):
    """Fold LayerNorm gamma/beta and b6 into the last matmul, pad it to a
    lane-dense OUT_PAD width, cast matmul operands to bf16, and pack the three
    small bias rows into one (3, OUT_PAD) f32 operand.

    Called ONCE at parameter-load time (outside the jitted forward) -- these
    ~10 tiny XLA ops must not be re-executed every step."""
    H, Hd, C = LAST_LAYER_INPUT_SIZE, HIDDEN, NO_OF_CLASSES
    w6_eff = params["gamma"].reshape(Hd, 1) * params["w6"]                 # [64, C]
    w6_pad = jnp.zeros((Hd, OUT_PAD), jnp.float32).at[:, :C].set(w6_eff)
    b_out = params["beta"].reshape(1, Hd) @ params["w6"] + params["b6"]    # [1, C]
    b_out_pad = jnp.zeros((1, OUT_PAD), jnp.float32).at[:, :C].set(b_out)
    b3_pad = jnp.zeros((1, OUT_PAD), jnp.float32).at[:, :Hd].set(params["b3"])
    bp_pad = jnp.zeros((1, OUT_PAD), jnp.float32).at[:, :H].set(
        params["b_pool"].reshape(1, H))
    consts = jnp.concatenate([bp_pad, b3_pad, b_out_pad], axis=0)          # [3, OUT_PAD]
    return dict(
        w_pool=params["w_pool"].astype(jnp.bfloat16),
        w3=params["w3"].astype(jnp.bfloat16),
        w6=w6_pad.astype(jnp.bfloat16),
        consts=consts.astype(jnp.float32),
    )


# --------------------- stub base model (plain JAX glue) ----------------------
def stub_base_model_features(ids, mask, token_type_ids, stub_params):
    """Masked mean of (token + type) embeddings, accumulated in f32, emitted
    in bf16 so the kernel's input DMA traffic is halved (the kernel only ever
    uses it as a bf16 MXU operand).
    TODO(synk): the pretrained transformer base model (l1) itself is not
    translated; this stub reproduces only the pooler_output interface (its
    pooler dense + tanh is fused into the Pallas kernel)."""
    tok = stub_params["tok_emb"][ids]                # [B, S, H]
    typ = stub_params["typ_emb"][token_type_ids]     # [B, S, H]
    h = tok + typ
    m = mask.astype(jnp.float32)[..., None]          # [B, S, 1]
    pre = jnp.sum(h * m, axis=1) / jnp.maximum(jnp.sum(m, axis=1), 1.0)
    return pre.astype(jnp.bfloat16)                  # [B, H] bf16


# ----------------------------- full forward ----------------------------------
@jax.jit
def model_with_nn_forward(ids, mask, token_type_ids, stub_params, packed):
    pre = stub_base_model_features(ids, mask, token_type_ids, stub_params)   # [B, H] bf16
    out_pad = fused_head_forward(pre, packed["w_pool"], packed["w3"],
                                 packed["w6"], packed["consts"])             # [B, OUT_PAD] bf16
    # Only C of the 128 lanes carry data; slice + widen to f32 logits here.
    return out_pad[:, :NO_OF_CLASSES].astype(jnp.float32)                    # [B, C] f32


# ----------------------------- references ------------------------------------
def reference_head_mirror(pre_bf16, packed):
    """Mirrors the kernel's math exactly (bf16 operands, folded constants,
    bf16 output quantization).  Tight tolerance: validates the Pallas lowering."""
    H = LAST_LAYER_INPUT_SIZE
    consts = packed["consts"]
    p = jnp.dot(pre_bf16, packed["w_pool"],
                preferred_element_type=jnp.float32) + consts[0:1, :H]
    p = jnp.tanh(p)
    h = jnp.dot(p.astype(jnp.bfloat16), packed["w3"],
                preferred_element_type=jnp.float32) + consts[1:2, :HIDDEN]
    mean = jnp.mean(h, axis=-1, keepdims=True)
    var = jnp.mean((h - mean) ** 2, axis=-1, keepdims=True)
    z = (h - mean) * lax.rsqrt(var + LN_EPS)
    out = jnp.dot(z.astype(jnp.bfloat16), packed["w6"],
                  preferred_element_type=jnp.float32) + consts[2:3, :]
    return out[:, :NO_OF_CLASSES].astype(jnp.bfloat16).astype(jnp.float32)


def reference_head_f32(pre_f32, params):
    """Pure-f32, unfused head identical to the PyTorch module (Dropout = id in
    eval): Linear(H,64) -> LayerNorm(64) -> Linear(64,C), preceded by the
    pooler dense + tanh.  Loose tolerance: documents the bf16/folding
    precision decision and catches folding/casting bugs."""
    pooled = jnp.tanh(pre_f32 @ params["w_pool"] + params["b_pool"].reshape(1, -1))
    h = pooled @ params["w3"] + params["b3"]
    mean = jnp.mean(h, axis=-1, keepdims=True)
    var = jnp.mean((h - mean) ** 2, axis=-1, keepdims=True)
    z = (h - mean) * lax.rsqrt(var + LN_EPS)
    z = params["gamma"] * z + params["beta"]
    return z @ params["w6"] + params["b6"]


# ----------------------------- parameter init --------------------------------
def init_params(key):
    ks = jax.random.split(key, 8)
    H, Hd, C = LAST_LAYER_INPUT_SIZE, HIDDEN, NO_OF_CLASSES
    return {
        # stub base model
        "tok_emb": jax.random.normal(ks[0], (VOCAB, H), jnp.float32) * 0.02,
        "typ_emb": jax.random.normal(ks[1], (2, H), jnp.float32) * 0.02,
        "w_pool": jax.random.normal(ks[2], (H, H), jnp.float32) * 0.02,
        "b_pool": jnp.zeros((H,), jnp.float32),
        # l3: Linear(H, 64)
        "w3": jax.random.normal(ks[3], (H, Hd), jnp.float32) * (1.0 / H) ** 0.5,
        "b3": jax.random.normal(ks[4], (1, Hd), jnp.float32) * 0.01,
        # l4: LayerNorm(64)
        "gamma": jnp.ones((1, Hd), jnp.float32),
        "beta": jnp.zeros((1, Hd), jnp.float32),
        # l6: Linear(64, C)
        "w6": jax.random.normal(ks[5], (Hd, C), jnp.float32) * (1.0 / Hd) ** 0.5,
        "b6": jax.random.normal(ks[6], (1, C), jnp.float32) * 0.01,
    }


# ----------------------------- main ------------------------------------------
if __name__ == "__main__":
    key = jax.random.PRNGKey(0)
    k_ids, k_mask, k_params = jax.random.split(key, 3)

    ids = jax.random.randint(k_ids, (BATCH, SEQ), 0, VOCAB, dtype=jnp.int32)
    mask = (jax.random.uniform(k_mask, (BATCH, SEQ)) > 0.2).astype(jnp.int32)
    mask = mask.at[:, 0].set(1)  # ensure at least one valid token per row
    token_type_ids = jnp.zeros((BATCH, SEQ), jnp.int32)

    params = init_params(k_params)
    stub_params = {"tok_emb": params["tok_emb"], "typ_emb": params["typ_emb"]}
    packed = pack_head_params(params)   # ONCE, outside the jitted forward

    logits = model_with_nn_forward(ids, mask, token_type_ids, stub_params, packed)
    logits = jax.block_until_ready(logits)
    assert logits.shape == (BATCH, NO_OF_CLASSES)

    pre_bf16 = stub_base_model_features(ids, mask, token_type_ids, stub_params)

    # (1) kernel vs. exact mirror of its own math (tight).
    mirror = reference_head_mirror(pre_bf16, packed)
    assert jnp.allclose(logits, mirror, atol=2e-2, rtol=2e-2), (
        float(jnp.max(jnp.abs(logits - mirror))))

    # (2) kernel vs. pure-f32 unfused PyTorch-equivalent head (loose; bf16
    # operand casts + output quantization are an explicit precision decision).
    strict = reference_head_f32(pre_bf16.astype(jnp.float32), params)
    assert jnp.allclose(logits, strict, atol=5e-2, rtol=5e-2), (
        float(jnp.max(jnp.abs(logits - strict))))

    print("KERNEL_OK")
</pallas_src>

<mosaic_0001>
module attributes {stable_mosaic.version = 11 : i64} {
  func.func @fused_kernel(%arg0: i32, %arg1: memref<8x128xbf16, #tpu.memory_space<vmem>>, %arg2: memref<128x128xbf16, #tpu.memory_space<vmem>>, %arg3: memref<128x64xbf16, #tpu.memory_space<vmem>>, %arg4: memref<64x128xbf16, #tpu.memory_space<vmem>>, %arg5: memref<3x128xf32, #tpu.memory_space<vmem>>, %arg6: memref<8x128xbf16, #tpu.memory_space<vmem>>) attributes {dimension_semantics = [#tpu.dimension_semantics<parallel>], iteration_bounds = array<i64: 1>, scalar_prefetch = 0 : i64, scratch_operands = 0 : i64, tpu.core_type = #tpu.core_type<tc>, window_params = [{transform_indices = @transform_0, window_bounds = array<i64: 8, 128>}, {pipeline_mode = #tpu.pipeline_mode<synchronous>, transform_indices = @transform_1, window_bounds = array<i64: 128, 128>}, {pipeline_mode = #tpu.pipeline_mode<synchronous>, transform_indices = @transform_2, window_bounds = array<i64: 128, 64>}, {pipeline_mode = #tpu.pipeline_mode<synchronous>, transform_indices = @transform_3, window_bounds = array<i64: 64, 128>}, {pipeline_mode = #tpu.pipeline_mode<synchronous>, transform_indices = @transform_4, window_bounds = array<i64: 3, 128>}, {transform_indices = @transform_5, window_bounds = array<i64: 8, 128>}]} {
    %c0 = arith.constant 0 : index
    %c0_0 = arith.constant 0 : index
    %0 = vector.load %arg1[%c0, %c0_0] : memref<8x128xbf16, #tpu.memory_space<vmem>>, vector<8x128xbf16>
    %c0_1 = arith.constant 0 : index
    %c0_2 = arith.constant 0 : index
    %1 = vector.load %arg5[%c0_1, %c0_2] : memref<3x128xf32, #tpu.memory_space<vmem>>, vector<3x128xf32>
    %2 = vector.extract_strided_slice %1 {offsets = [0, 0], sizes = [1, 128], strides = [1, 1]} : vector<3x128xf32> to vector<1x128xf32>
    %3 = vector.extract_strided_slice %1 {offsets = [1, 0], sizes = [1, 64], strides = [1, 1]} : vector<3x128xf32> to vector<1x64xf32>
    %4 = vector.extract_strided_slice %1 {offsets = [2, 0], sizes = [1, 128], strides = [1, 1]} : vector<3x128xf32> to vector<1x128xf32>
    %c0_3 = arith.constant 0 : index
    %c0_4 = arith.constant 0 : index
    %5 = vector.load %arg2[%c0_3, %c0_4] : memref<128x128xbf16, #tpu.memory_space<vmem>>, vector<128x128xbf16>
    %cst = arith.constant dense<0.000000e+00> : vector<8x128xf32>
    %6 = tpu.matmul %0, %5, %cst {dimension_numbers = #tpu.dot_dimension_numbers<[1], [0], [0], [1], [0, 0, 1, 1], [], []>} : vector<8x128xbf16>, vector<128x128xbf16>, vector<8x128xf32> -> vector<8x128xf32>
    %7 = vector.broadcast %2 : vector<1x128xf32> to vector<8x128xf32>
    %8 = arith.addf %6, %7 : vector<8x128xf32>
    %9 = math.tanh %8 : vector<8x128xf32>
    %10 = arith.truncf %9 : vector<8x128xf32> to vector<8x128xbf16>
    %c0_5 = arith.constant 0 : index
    %c0_6 = arith.constant 0 : index
    %11 = vector.load %arg3[%c0_5, %c0_6] : memref<128x64xbf16, #tpu.memory_space<vmem>>, vector<128x64xbf16>
    %cst_7 = arith.constant dense<0.000000e+00> : vector<8x64xf32>
    %12 = tpu.matmul %10, %11, %cst_7 {dimension_numbers = #tpu.dot_dimension_numbers<[1], [0], [0], [1], [0, 0, 1, 1], [], []>} : vector<8x128xbf16>, vector<128x64xbf16>, vector<8x64xf32> -> vector<8x64xf32>
    %13 = vector.broadcast %3 : vector<1x64xf32> to vector<8x64xf32>
    %14 = arith.addf %12, %13 : vector<8x64xf32>
    %cst_8 = arith.constant dense<0.000000e+00> : vector<8xf32>
    %15 = vector.multi_reduction <add>, %14, %cst_8 [1] : vector<8x64xf32> to vector<8xf32>
    %16 = vector.shape_cast %15 : vector<8xf32> to vector<8x1xf32>
    %cst_9 = arith.constant 6.400000e+01 : f32
    %17 = vector.broadcast %cst_9 : f32 to vector<8x1xf32>
    %18 = arith.divf %16, %17 : vector<8x1xf32>
    %19 = vector.broadcast %18 : vector<8x1xf32> to vector<8x64xf32>
    %20 = arith.subf %14, %19 : vector<8x64xf32>
    %21 = arith.mulf %20, %20 : vector<8x64xf32>
    %cst_10 = arith.constant dense<0.000000e+00> : vector<8xf32>
    %22 = vector.multi_reduction <add>, %21, %cst_10 [1] : vector<8x64xf32> to vector<8xf32>
    %23 = vector.shape_cast %22 : vector<8xf32> to vector<8x1xf32>
    %cst_11 = arith.constant 6.400000e+01 : f32
    %24 = vector.broadcast %cst_11 : f32 to vector<8x1xf32>
    %25 = arith.divf %23, %24 : vector<8x1xf32>
    %cst_12 = arith.constant 9.99999974E-6 : f32
    %26 = vector.broadcast %cst_12 : f32 to vector<8x1xf32>
    %27 = arith.addf %25, %26 : vector<8x1xf32>
    %28 = math.rsqrt %27 : vector<8x1xf32>
    %29 = vector.broadcast %28 : vector<8x1xf32> to vector<8x64xf32>
    %30 = arith.mulf %20, %29 : vector<8x64xf32>
    %31 = arith.truncf %30 : vector<8x64xf32> to vector<8x64xbf16>
    %c0_13 = arith.constant 0 : index
    %c0_14 = arith.constant 0 : index
    %32 = vector.load %arg4[%c0_13, %c0_14] : memref<64x128xbf16, #tpu.memory_space<vmem>>, vector<64x128xbf16>
    %cst_15 = arith.constant dense<0.000000e+00> : vector<8x128xf32>
    %33 = tpu.matmul %31, %32, %cst_15 {dimension_numbers = #tpu.dot_dimension_numbers<[1], [0], [0], [1], [0, 0, 1, 1], [], []>} : vector<8x64xbf16>, vector<64x128xbf16>, vector<8x128xf32> -> vector<8x128xf32>
    %34 = vector.broadcast %4 : vector<1x128xf32> to vector<8x128xf32>
    %35 = arith.addf %33, %34 : vector<8x128xf32>
    %36 = arith.truncf %35 : vector<8x128xf32> to vector<8x128xbf16>
    %c0_16 = arith.constant 0 : index
    %c0_17 = arith.constant 0 : index
    %37 = vector.load %arg6[%c0_16, %c0_17] : memref<8x128xbf16, #tpu.memory_space<vmem>>, vector<8x128xbf16>
    tpu.vector_store %arg6[%c0_16, %c0_17], %36 {strides = array<i32>} : memref<8x128xbf16, #tpu.memory_space<vmem>>, vector<8x128xbf16>,
    return
  }
  func.func @transform_0(%arg0: i32) -> (i32, i32) {
    %c0_i32 = arith.constant 0 : i32
    %c0_i32_0 = arith.constant 0 : i32
    return %arg0, %c0_i32 : i32, i32
  }
  func.func @transform_1(%arg0: i32) -> (i32, i32) {
    %c0_i32 = arith.constant 0 : i32
    %c0_i32_0 = arith.constant 0 : i32
    %c0_i32_1 = arith.constant 0 : i32
    return %c0_i32, %c0_i32_0 : i32, i32
  }
  func.func @transform_2(%arg0: i32) -> (i32, i32) {
    %c0_i32 = arith.constant 0 : i32
    %c0_i32_0 = arith.constant 0 : i32
    %c0_i32_1 = arith.constant 0 : i32
    return %c0_i32, %c0_i32_0 : i32, i32
  }
  func.func @transform_3(%arg0: i32) -> (i32, i32) {
    %c0_i32 = arith.constant 0 : i32
    %c0_i32_0 = arith.constant 0 : i32
    %c0_i32_1 = arith.constant 0 : i32
    return %c0_i32, %c0_i32_0 : i32, i32
  }
  func.func @transform_4(%arg0: i32) -> (i32, i32) {
    %c0_i32 = arith.constant 0 : i32
    %c0_i32_0 = arith.constant 0 : i32
    %c0_i32_1 = arith.constant 0 : i32
    return %c0_i32, %c0_i32_0 : i32, i32
  }
  func.func @transform_5(%arg0: i32) -> (i32, i32) {
    %c0_i32 = arith.constant 0 : i32
    %c0_i32_0 = arith.constant 0 : i32
    return %arg0, %c0_i32 : i32, i32
  }
}

</mosaic_0001>

<bundles_post_ra>
// kernel: model_with_nn_forward.1
= control target key start
LH: loop header
LB: loop body
LE: loop exit
PB: predicated region body
PF: predicated region fallthrough
CT: control target
= control target key end

     0   :  { %v464_v0 = vmov 0.0   ;;  %vm465_vm0 = vmmov 0   ;;  %v39_v18 = vlaneseq  ;;  %vm241_vm1 = vcmask 523264   ;;  %s594_s1 = inlined_call_operand.vmem [shape: bf16[128,128], index: 1, kind: input, shape index: {}]   ;;  %s595_s2 = inlined_call_operand.vmem [shape: bf16[128,64], index: 2, kind: input, shape index: {}]   ;;  %s596_s0 = inlined_call_operand.vmem [shape: bf16[8,128], index: 0, kind: input, shape index: {}]   ;;  %s597_s4 = inlined_call_operand.vmem [shape: f32[3,128], index: 4, kind: input, shape index: {}]   ;;  %s598_s3 = inlined_call_operand.vmem [shape: bf16[64,128], index: 3, kind: input, shape index: {}]   ;;  %s599_s5 = inlined_call_operand.vmem [shape: bf16[8,128], index: 5, kind: output, shape index: {}]  }
   0x1   :  { %386 = vmatprep.subr.bf16.mxu0 %v464_v0  ;;  %v440_v1 = vld [vmem:[%s594_s1] sm:$0xff]   ;;  %402 = vmatprep.mubr.msk.bf16.mxu0 %vm465_vm0, %v464_v0  ;;  %v441_v2 = vld [vmem:[%s594_s1 + $0x8] sm:$0xff]   ;;  %v442_v3 = vld [vmem:[%s594_s1 + $0x10] sm:$0xff]  }
   0x2   :  { %406 = vmatprep.subr.bf16.mxu1 %v464_v0  ;;  %422 = vmatprep.mubr.msk.bf16.mxu1 %vm465_vm0, %v464_v0  ;;  %v448_v4 = vld [vmem:[%s595_s2] sm:$0xff]   ;;  %v443_v5 = vld [vmem:[%s594_s1 + $0x18] sm:$0xff]   ;;  %v449_v6 = vld [vmem:[%s595_s2 + $0x8] sm:$0xff]   ;;  %v40_v19 = vshrl.u32 %v39_v18, 7 }
   0x3   :  { %387 = vmatpush3.bf16.msra.mxu0 %v440_v1  ;;  %407 = vmatpush3.bf16.msra.mxu1 %v448_v4  ;;  %v444_v7 = vld [vmem:[%s594_s1 + $0x20] sm:$0xff]   ;;  %v450_v8 = vld [vmem:[%s595_s2 + $0x10] sm:$0xff]   ;;  %v445_v9 = vld [vmem:[%s594_s1 + $0x28] sm:$0xff]  }
   0x4   :  { %388 = vmatprep.subr.bf16.mxu0 %v464_v0  ;;  %408 = vmatprep.subr.bf16.mxu1 %v464_v0  ;;  %v451_v10 = vld [vmem:[%s595_s2 + $0x18] sm:$0xff]   ;;  %v446_v11 = vld [vmem:[%s594_s1 + $0x30] sm:$0xff]   ;;  %v21_v13 = vld [vmem:[%s596_s0] sm:$0xf]  ;;  %v41_v20 = vsub.s32 0, %v40_v19  ;;  %v151_v30 = vsub.s32 1, %v40_v19 }
   0x5   :  { %v447_v12 = vld [vmem:[%s594_s1 + $0x38] sm:$0xff]   ;;  %v452_v14 = vld [vmem:[%s595_s2 + $0x20] sm:$0xff]   ;;  %v453_v15 = vld [vmem:[%s595_s2 + $0x28] sm:$0xff]   ;;  %v267_v53 = vsub.s32 2, %v40_v19 }
   0x6   :  { %v454_v16 = vld [vmem:[%s595_s2 + $0x30] sm:$0xff]   ;;  %v455_v17 = vld [vmem:[%s595_s2 + $0x38] sm:$0xff]   ;;  %v22_v21 = vld [vmem:[%s597_s4] sm:$0x7] }
   0x7   :  { %389 = vmatpush3.bf16.msra.mxu0 %v441_v2  ;;  %409 = vmatpush3.bf16.msra.mxu1 %v449_v6  ;;  %v42_v22 = vrot.slane %v22_v21, %v41_v20  ;;  %v152_v31 = vrot.slane %v22_v21, %v151_v30  ;;  %v456_v43 = vld [vmem:[%s598_s3] sm:$0xff]   ;;  %v457_v44 = vld [vmem:[%s598_s3 + $0x8] sm:$0xff]   ;;  %v458_v45 = vld [vmem:[%s598_s3 + $0x10] sm:$0xff]   ;;  %v268_v54 = vrot.slane %v22_v21, %v267_v53 }
   0x8   :  { %390 = vmatprep.subr.bf16.mxu0 %v464_v0  ;;  %410 = vmatprep.subr.bf16.mxu1 %v464_v0  ;;  %v459_v46 = vld [vmem:[%s598_s3 + $0x18] sm:$0xff]  }
   0xb   :  { %391 = vmatpush3.bf16.msra.mxu0 %v442_v3  ;;  %411 = vmatpush3.bf16.msra.mxu1 %v450_v8 }
   0xc   :  { %392 = vmatprep.subr.bf16.mxu0 %v464_v0  ;;  %412 = vmatprep.subr.bf16.mxu1 %v464_v0 }
   0xf   :  { %393 = vmatpush3.bf16.msra.mxu0 %v443_v5  ;;  %413 = vmatpush3.bf16.msra.mxu1 %v451_v10 }
  0x10   :  { %394 = vmatprep.subr.bf16.mxu0 %v464_v0  ;;  %414 = vmatprep.subr.bf16.mxu1 %v464_v0 }
  0x13   :  { %395 = vmatpush3.bf16.msra.mxu0 %v444_v7  ;;  %415 = vmatpush3.bf16.msra.mxu1 %v452_v14 }
  0x14   :  { %396 = vmatprep.subr.bf16.mxu0 %v464_v0  ;;  %416 = vmatprep.subr.bf16.mxu1 %v464_v0 }
  0x17   :  { %397 = vmatpush3.bf16.msra.mxu0 %v445_v9  ;;  %417 = vmatpush3.bf16.msra.mxu1 %v453_v15 }
  0x18   :  { %398 = vmatprep.subr.bf16.mxu0 %v464_v0  ;;  %418 = vmatprep.subr.bf16.mxu1 %v464_v0 }
  0x1b   :  { %399 = vmatpush3.bf16.msra.mxu0 %v446_v11  ;;  %419 = vmatpush3.bf16.msra.mxu1 %v454_v16 }
  0x1c   :  { %400 = vmatprep.subr.bf16.mxu0 %v464_v0  ;;  %420 = vmatprep.subr.bf16.mxu1 %v464_v0 }
  0x1f   :  { %401 = vmatpush3.bf16.msra.mxu0 %v447_v12  ;;  %421 = vmatpush3.bf16.msra.mxu1 %v455_v17 }
  0x20   :  { %426 = vmatprep.subr.bf16.mxu0 %v464_v0 }
  0x22   :  { %403 = vmatmul.mubr.bf16.vlgmr.msra.gmra.mrb[0].mxu0 %v21_v13 }
  0x23   :  { %434 = vmatprep.mubr.msk.bf16.mxu0 %vm465_vm0, %v464_v0  ;;  %427 = vmatpush3.bf16.msra.mxu0 %v456_v43 }
  0x24   :  { %428 = vmatprep.subr.bf16.mxu0 %v464_v0 }
  0x27   :  { %429 = vmatpush3.bf16.msra.mxu0 %v457_v44 }
  0x28   :  { %430 = vmatprep.subr.bf16.mxu0 %v464_v0 }
  0x2b   :  { %431 = vmatpush3.bf16.msra.mxu0 %v458_v45 }
  0x2c   :  { %432 = vmatprep.subr.bf16.mxu0 %v464_v0 }
  0x2f   :  { %433 = vmatpush3.bf16.msra.mxu0 %v459_v46 }
  0xf5   :  { %v125_v23 = vpop.f32.mrb[0].mxu0 }
  0xf6   :  { %v126_v24 = vadd.f32 %v125_v23, %v42_v22  ;;  %v404_v25 = vpop.f32.mrb[1].mxu0 }
  0xf7   :  { %v128_v26 = vpop.f32.mrb[2].mxu0 }
  0xf8   :  { %460 = vtanh.f32 %v126_v24  ;;  %v405_v27 = vpop.f32.mrb[3].mxu0 }
 0x102   :  { %v461_v28 = vpop.eup %460 }
 0x103   :  { %v132_v29 = vpack.c.bf16 %v461_v28, %v461_v28 }
 0x105   :  { %423 = vmatmul.mubr.bf16.vlgmr.msra.gmra.mrb[0].mxu1 %v132_v29 }
 0x1d8   :  { %v235_v32 = vpop.f32.mrb[0].mxu1 }
 0x1d9   :  { %v236_v33 = vadd.f32 %v235_v32, %v152_v31  ;;  %v424_v34 = vpop.f32.mrb[1].mxu1 }
 0x1da   :  { %v238_v35 = vpop.f32.mrb[2].mxu1 }
 0x1db   :  { %v425_v36 = vpop.f32.mrb[3].mxu1  ;;  %v242_v37 = vsel %vm241_vm1, %v236_v33, 0.0 }
 0x1dc   :  { %243 = vadd.xlane.f32.xlu0 %v242_v37 }
 0x269   :  { %v244_v38 = vpop.xlane.xlu0 %243 }
 0x26a   :  { %v246_v39 = vmul.f32 0.015625, %v244_v38 }
 0x26c   :  { %v247_v40 = vsub.f32 %v236_v33, %v246_v39 }
 0x26e   :  { %v248_v41 = vmul.f32 %v247_v40, %v247_v40 }
 0x270   :  { %v249_v42 = vsel %vm241_vm1, %v248_v41, 0.0 }
 0x271   :  { %250 = vadd.xlane.f32.xlu0 %v249_v42 }
 0x2fe   :  { %v251_v47 = vpop.xlane.xlu0 %250 }
 0x2ff   :  { %v252_v48 = vmul.f32 0.015625, %v251_v47 }
 0x301   :  { %v253_v49 = vadd.f32 1e-05, %v252_v48 }
 0x303   :  { %462 = vrsqrt.f32 %v253_v49 }
 0x30d   :  { %v463_v50 = vpop.eup %462 }
 0x30e   :  { %v255_v51 = vmul.f32 %v463_v50, %v247_v40 }
 0x310   :  { %v256_v52 = vpack.c.bf16 %v255_v51, %v255_v51 }
 0x312   :  { %435 = vmatmul.mubr.msk.bf16.vlgmr.msra.gmra.mrb[4].mxu0 %vm241_vm1, %v256_v52 }
 0x3e5   :  { %v330_v55 = vpop.f32.mrb[4].mxu0 }
 0x3e6   :  { %v331_v56 = vadd.f32 %v330_v55, %v268_v54  ;;  %v436_v57 = vpop.f32.mrb[5].mxu0 }
 0x3e7   :  { %v333_v58 = vpop.f32.mrb[6].mxu0 }
 0x3e8   :  { %v336_v59 = vpack.c.bf16 %v331_v56, %v331_v56  ;;  %v437_v60 = vpop.f32.mrb[7].mxu0 }
 0x3ea   :  { %337 = vst [vmem:[%s599_s5] sm:$0xf] %v336_v59 }

</bundles_post_ra>
